<compile_context>
chip_gen: v5e
topology: v5e:2x2
jax: 0.10.0
libtpu: 0.0.40
codegen_flags: <defaults>
</compile_context>

<pallas_src>
import random

import jax
import jax.numpy as jnp
import numpy as np
from jax.experimental import pallas as pl
from jax.experimental.pallas import tpu as pltpu


def mean_agg_kernel(mask_ref, embed_ref, cnt_ref, out_ref, acc_ref):
    """Accumulate raw {0,1}-mask @ embed over K tiles; scale by 1/count at the end."""
    k = pl.program_id(2)

    @pl.when(k == 0)
    def _():
        acc_ref[...] = jnp.zeros_like(acc_ref)

    acc_ref[...] += jnp.dot(
        mask_ref[...], embed_ref[...], preferred_element_type=jnp.float32
    )

    @pl.when(k == pl.num_programs(2) - 1)
    def _():
        # [tm, 1] f32 neighbor counts; clamp guards zero-neighbor rows.
        inv = pl.reciprocal(jnp.maximum(cnt_ref[...], 1.0), approx=True)
        out_ref[...] = (acc_ref[...] * inv).astype(out_ref.dtype)


def _round_up(x: int, m: int) -> int:
    return ((x + m - 1) // m) * m


def mean_aggregate(
    mask: jax.Array,
    embed_matrix: jax.Array,
    counts: jax.Array,
    *,
    tm_max: int = 256,
    tn_max: int = 256,
    tk_max: int = 512,
) -> jax.Array:
    """mask: [B, U] {0,1}, embed_matrix: [U, D], counts: [B] -> [B, D] float32."""
    B, U = mask.shape
    U2, D = embed_matrix.shape
    assert U == U2
    assert counts.shape[0] == B

    # Tile sizes: sublane-aligned (8) on M, lane-aligned (128) on N and K.
    tm = min(tm_max, _round_up(B, 8))
    tn = min(tn_max, _round_up(D, 128))
    tk = min(tk_max, _round_up(U, 128))
    B_pad = _round_up(B, tm)
    D_pad = _round_up(D, tn)
    U_pad = _round_up(U, tk)

    # bf16 operands for the MXU; {0,1} mask is exact in bf16 (normalization is
    # applied at finalize in f32).  Zero padding keeps the matmul exact.
    mask_p = (
        jnp.zeros((B_pad, U_pad), jnp.bfloat16)
        .at[:B, :U]
        .set(mask.astype(jnp.bfloat16))
    )
    embed_p = (
        jnp.zeros((U_pad, D_pad), jnp.bfloat16)
        .at[:U, :D]
        .set(embed_matrix.astype(jnp.bfloat16))
    )
    cnt_p = (
        jnp.zeros((B_pad, 1), jnp.float32)
        .at[:B, :]
        .set(counts.reshape(B, 1).astype(jnp.float32))
    )

    grid = (B_pad // tm, D_pad // tn, U_pad // tk)

    out_p = pl.pallas_call(
        mean_agg_kernel,
        out_shape=jax.ShapeDtypeStruct((B_pad, D_pad), jnp.float32),
        grid_spec=pltpu.PrefetchScalarGridSpec(
            num_scalar_prefetch=0,
            grid=grid,
            in_specs=[
                pl.BlockSpec((tm, tk), lambda i, j, k: (i, k)),   # mask tile
                pl.BlockSpec((tk, tn), lambda i, j, k: (k, j)),   # embed tile
                pl.BlockSpec((tm, 1), lambda i, j, k: (i, 0)),    # per-row counts
            ],
            out_specs=pl.BlockSpec((tm, tn), lambda i, j, k: (i, j)),
            scratch_shapes=[pltpu.VMEM((tm, tn), jnp.float32)],
        ),
        compiler_params=pltpu.CompilerParams(
            dimension_semantics=("parallel", "parallel", "arbitrary"),
            vmem_limit_bytes=32 * 1024 * 1024,
        ),
    )(mask_p, embed_p, cnt_p)

    return out_p[:B, :D]


def build_mask_and_unique(nodes, to_neighs, num_sample=10, gcn=False, seed=0):
    """Python glue mirroring MeanAggregator.forward's set logic.

    Returns (mask [B, U] float32 ndarray, unique_nodes_list, counts [B] float32).
    """
    random.seed(seed)  # deterministic neighbor sampling
    _set = set
    if num_sample is not None:
        _sample = random.sample
        samp_neighs = [
            _set(_sample(sorted(to_neigh), num_sample))
            if len(to_neigh) >= num_sample
            else to_neigh
            for to_neigh in to_neighs
        ]
    else:
        samp_neighs = to_neighs
    if gcn:
        samp_neighs = [
            samp_neigh.union({int(nodes[i])})
            for i, samp_neigh in enumerate(samp_neighs)
        ]
    unique_nodes_list = list(set.union(*samp_neighs))
    unique_nodes = {n: i for i, n in enumerate(unique_nodes_list)}

    B = len(samp_neighs)
    U = len(unique_nodes)
    mask = np.zeros((B, U), dtype=np.float32)
    column_indices = [unique_nodes[n] for samp_neigh in samp_neighs for n in samp_neigh]
    row_indices = [i for i in range(len(samp_neighs)) for _ in samp_neighs[i]]
    mask[row_indices, column_indices] = 1.0
    counts = np.array([len(s) for s in samp_neighs], dtype=np.float32)
    return mask, unique_nodes_list, counts


if __name__ == "__main__":
    # ---- deterministic synthetic setup ---------------------------------
    num_nodes = 2048    # total nodes in the graph
    feat_dim = 160      # embedding dimension (multi N-tile when tn_max=128)
    batch = 16          # number of batch nodes
    num_sample = 10     # neighbors sampled per node -> U ~ 150 (multi K-tile)

    key = jax.random.PRNGKey(0)
    # "features" function == embedding table lookup; init deterministically.
    feature_table = jax.random.normal(key, (num_nodes, feat_dim), dtype=jnp.float32)

    # synthetic graph: node i's neighbor set (12 distinct neighbors each)
    rng = np.random.RandomState(0)
    nodes = list(range(batch))
    to_neighs = [
        set(int(x) for x in rng.choice(num_nodes, size=12, replace=False))
        for _ in nodes
    ]

    # glue: neighbor sampling + dense mask construction (python, like the module)
    mask_np, unique_nodes_list, counts_np = build_mask_and_unique(
        nodes, to_neighs, num_sample=num_sample, gcn=False, seed=0
    )
    mask = jnp.asarray(mask_np)
    counts = jnp.asarray(counts_np)

    # glue: embed_matrix = features(unique_nodes_list)  (embedding gather)
    unique_idx = jnp.asarray(unique_nodes_list, dtype=jnp.int32)
    embed_matrix = jnp.take(feature_table, unique_idx, axis=0)

    # ---- Pallas kernel: tiled bf16 matmul + finalize scale ---------------
    # (1) production-style tile caps: single grid point at this toy size
    out_default = mean_aggregate(mask, embed_matrix, counts)
    # (2) small tile caps to exercise the full (M, N, K) grid / accumulator path
    out_tiled = mean_aggregate(
        mask, embed_matrix, counts, tm_max=8, tn_max=128, tk_max=128
    )
    out_default = jax.block_until_ready(out_default)
    out_tiled = jax.block_until_ready(out_tiled)

    # ---- reference checks ------------------------------------------------
    num_neigh = jnp.maximum(jnp.sum(mask, axis=1, keepdims=True), 1.0)
    # exact-f32 reference (module semantics): loose tolerance for bf16 operands
    ref_f32 = (mask / num_neigh) @ embed_matrix
    # bf16-consistent reference: tight check of the kernel's accumulate/scale logic
    ref_bf16 = (mask @ embed_matrix.astype(jnp.bfloat16).astype(jnp.float32)) / num_neigh

    for out in (out_default, out_tiled):
        np.testing.assert_allclose(
            np.asarray(out), np.asarray(ref_f32), rtol=5e-2, atol=5e-2
        )
        np.testing.assert_allclose(
            np.asarray(out), np.asarray(ref_bf16), rtol=1e-2, atol=1e-2
        )
    np.testing.assert_allclose(
        np.asarray(out_default), np.asarray(out_tiled), rtol=1e-2, atol=1e-2
    )

    print("KERNEL_OK")
</pallas_src>

<mosaic_0001>
module attributes {stable_mosaic.version = 11 : i64} {
  func.func @mean_agg_kernel(%arg0: i32, %arg1: i32, %arg2: i32, %arg3: memref<16x256xbf16, #tpu.memory_space<vmem>>, %arg4: memref<256x256xbf16, #tpu.memory_space<vmem>>, %arg5: memref<16x1xf32, #tpu.memory_space<vmem>>, %arg6: memref<16x256xf32, #tpu.memory_space<vmem>>, %arg7: memref<16x256xf32, #tpu.memory_space<vmem>>) attributes {dimension_semantics = [#tpu.dimension_semantics<parallel>, #tpu.dimension_semantics<parallel>, #tpu.dimension_semantics<arbitrary>], iteration_bounds = array<i64: 1, 1, 1>, scalar_prefetch = 0 : i64, scratch_operands = 1 : i64, tpu.core_type = #tpu.core_type<tc>, window_params = [{transform_indices = @transform_0, window_bounds = array<i64: 16, 256>}, {transform_indices = @transform_1, window_bounds = array<i64: 256, 256>}, {transform_indices = @transform_2, window_bounds = array<i64: 16, 1>}, {transform_indices = @transform_3, window_bounds = array<i64: 16, 256>}]} {
    %c0_i32 = arith.constant 0 : i32
    %0 = arith.cmpi eq, %arg2, %c0_i32 : i32
    %1 = arith.extui %0 : i1 to i32
    %c0_i32_0 = arith.constant 0 : i32
    %2 = arith.cmpi ne, %1, %c0_i32_0 : i32
    scf.if %2 {
      %cst_10 = arith.constant 0.000000e+00 : f32
      %12 = vector.broadcast %cst_10 : f32 to vector<16x256xf32>
      %c0_11 = arith.constant 0 : index
      %c0_12 = arith.constant 0 : index
      %13 = vector.load %arg7[%c0_11, %c0_12] : memref<16x256xf32, #tpu.memory_space<vmem>>, vector<16x256xf32>
      tpu.vector_store %arg7[%c0_11, %c0_12], %12 {strides = array<i32>} : memref<16x256xf32, #tpu.memory_space<vmem>>, vector<16x256xf32>,
    } else {
    }
    %c0 = arith.constant 0 : index
    %c0_1 = arith.constant 0 : index
    %3 = vector.load %arg7[%c0, %c0_1] : memref<16x256xf32, #tpu.memory_space<vmem>>, vector<16x256xf32>
    %c0_2 = arith.constant 0 : index
    %c0_3 = arith.constant 0 : index
    %4 = vector.load %arg3[%c0_2, %c0_3] : memref<16x256xbf16, #tpu.memory_space<vmem>>, vector<16x256xbf16>
    %c0_4 = arith.constant 0 : index
    %c0_5 = arith.constant 0 : index
    %5 = vector.load %arg4[%c0_4, %c0_5] : memref<256x256xbf16, #tpu.memory_space<vmem>>, vector<256x256xbf16>
    %cst = arith.constant dense<0.000000e+00> : vector<16x256xf32>
    %6 = tpu.matmul %4, %5, %cst {dimension_numbers = #tpu.dot_dimension_numbers<[1], [0], [0], [1], [0, 0, 1, 1], [], []>} : vector<16x256xbf16>, vector<256x256xbf16>, vector<16x256xf32> -> vector<16x256xf32>
    %7 = arith.addf %3, %6 : vector<16x256xf32>
    %c0_6 = arith.constant 0 : index
    %c0_7 = arith.constant 0 : index
    %8 = vector.load %arg7[%c0_6, %c0_7] : memref<16x256xf32, #tpu.memory_space<vmem>>, vector<16x256xf32>
    tpu.vector_store %arg7[%c0_6, %c0_7], %7 {strides = array<i32>} : memref<16x256xf32, #tpu.memory_space<vmem>>, vector<16x256xf32>,
    %c0_i32_8 = arith.constant 0 : i32
    %9 = arith.cmpi eq, %arg2, %c0_i32_8 : i32
    %10 = arith.extui %9 : i1 to i32
    %c0_i32_9 = arith.constant 0 : i32
    %11 = arith.cmpi ne, %10, %c0_i32_9 : i32
    scf.if %11 {
      %c0_10 = arith.constant 0 : index
      %c0_11 = arith.constant 0 : index
      %12 = vector.load %arg5[%c0_10, %c0_11] : memref<16x1xf32, #tpu.memory_space<vmem>>, vector<16x1xf32>
      %cst_12 = arith.constant 1.000000e+00 : f32
      %13 = vector.broadcast %cst_12 : f32 to vector<16x1xf32>
      %14 = arith.maximumf %12, %13 : vector<16x1xf32>
      %15 = tpu.reciprocal %14 {approx = true} : vector<16x1xf32> -> vector<16x1xf32>
      %c0_13 = arith.constant 0 : index
      %c0_14 = arith.constant 0 : index
      %16 = vector.load %arg7[%c0_13, %c0_14] : memref<16x256xf32, #tpu.memory_space<vmem>>, vector<16x256xf32>
      %17 = vector.broadcast %15 : vector<16x1xf32> to vector<16x256xf32>
      %18 = arith.mulf %16, %17 : vector<16x256xf32>
      %c0_15 = arith.constant 0 : index
      %c0_16 = arith.constant 0 : index
      %19 = vector.load %arg6[%c0_15, %c0_16] : memref<16x256xf32, #tpu.memory_space<vmem>>, vector<16x256xf32>
      tpu.vector_store %arg6[%c0_15, %c0_16], %18 {strides = array<i32>} : memref<16x256xf32, #tpu.memory_space<vmem>>, vector<16x256xf32>,
    } else {
    }
    return
  }
  func.func @transform_0(%arg0: i32, %arg1: i32, %arg2: i32) -> (i32, i32) {
    %c0_i32 = arith.constant 0 : i32
    return %arg0, %arg2 : i32, i32
  }
  func.func @transform_1(%arg0: i32, %arg1: i32, %arg2: i32) -> (i32, i32) {
    %c0_i32 = arith.constant 0 : i32
    return %arg2, %arg1 : i32, i32
  }
  func.func @transform_2(%arg0: i32, %arg1: i32, %arg2: i32) -> (i32, i32) {
    %c0_i32 = arith.constant 0 : i32
    %c0_i32_0 = arith.constant 0 : i32
    return %arg0, %c0_i32 : i32, i32
  }
  func.func @transform_3(%arg0: i32, %arg1: i32, %arg2: i32) -> (i32, i32) {
    %c0_i32 = arith.constant 0 : i32
    return %arg0, %arg1 : i32, i32
  }
}

</mosaic_0001>

<bundles_post_ra>
// kernel: tpu_custom_call.1
= control target key start
LH: loop header
LB: loop body
LE: loop exit
PB: predicated region body
PF: predicated region fallthrough
CT: control target
= control target key end

     0   :  { %8 = vsyncpa [#allocation4], 0  ;;  %s646_s0 = inlined_call_operand.vmem [shape: bf16[16,256], index: 0, kind: input, shape index: {}]   ;;  %s647_s1 = inlined_call_operand.hbm [shape: bf16[256,256], index: 1, kind: input, shape index: {}]   ;;  %s648_s2 = inlined_call_operand.vmem [shape: f32[16,1], index: 2, kind: input, shape index: {}]   ;;  %s649_s3 = inlined_call_operand.hbm [shape: f32[16,256], index: 3, kind: output, shape index: {}]  }
   0x1   :  { %9 = vsyncpa [#allocation5], 0  ;;  %s16_s14 = sshll.u32 %s647_s1, 4  ;;  %s595_s15 = smov [#allocation3]   ;;  %s17_s14 = int_to_ptr.hbm [resolvable:$true] %s16_s14 }
   0x2   :  { %s18_s16 = sshll.u32 %s595_s15, 4  ;;  %s596_s17 = smov 128   ;;  %s19_s16 = int_to_ptr.vmem [resolvable:$true] %s18_s16 }
   0x3   :  { %s597_s18 = smov 8  }
   0x4   :  { %24 = dma.hbm_to_vmem [thread:$0]  %s17_s14, 4096, %s19_s16, [#allocation4], %s596_s17, %s596_s17, %s597_s18  }
   0x5   :  { %591 = dma.done.wait [#allocation4], 4096  }
   0x6   :  { %592 = vsyncadd [#allocation4], 4294963200  ;;  %v427_v0 = vld [vmem:[#allocation3 + $0x70] sm:$0xf]  ;;  %v514_v1 = vld [vmem:[#allocation3 + $0x74] sm:$0xf0] }
   0x7   :  { %v491_v2 = vld [vmem:[#allocation3 + $0xf0] sm:$0xf]  ;;  %v428_v3 = vor.u32 %v514_v1, %v427_v0  ;;  %v530_v4 = vld [vmem:[#allocation3 + $0xf4] sm:$0xf0]  ;;  %v513_v5 = vld [vmem:[#allocation3 + $0x74] sm:$0xf] }
   0x8   :  { %v429_v6 = vld [vmem:[#allocation3 + $0x78] sm:$0xf0]  ;;  %v492_v7 = vor.u32 %v530_v4, %v491_v2  ;;  %v529_v9 = vld [vmem:[#allocation3 + $0xf4] sm:$0xf]  ;;  %v419_v11 = vld [vmem:[#allocation3 + $0x60] sm:$0xf] }
   0x9   :  { %v432_v8 = vor.u32 %v513_v5, %v429_v6  ;;  %v493_v10 = vld [vmem:[#allocation3 + $0xf8] sm:$0xf0]  ;;  %247 = vmatpush.bf16.msra.mxu0 %v428_v3  ;;  %v512_v13 = vld [vmem:[#allocation3 + $0x64] sm:$0xf0]  ;;  %v483_v14 = vld [vmem:[#allocation3 + $0xe0] sm:$0xf] }
   0xa   :  { %v496_v12 = vor.u32 %v529_v9, %v493_v10  ;;  %v528_v15 = vld [vmem:[#allocation3 + $0xe4] sm:$0xf0]  ;;  %261 = vmatpush.bf16.msra.mxu1 %v492_v7  ;;  %v420_v16 = vor.u32 %v512_v13, %v419_v11  ;;  %v511_v18 = vld [vmem:[#allocation3 + $0x64] sm:$0xf]  ;;  %v421_v19 = vld [vmem:[#allocation3 + $0x68] sm:$0xf0] }
   0xb   :  { %275 = vmatpush.bf16.msra.mxu2 %v432_v8  ;;  %v484_v17 = vor.u32 %v528_v15, %v483_v14  ;;  %v527_v20 = vld [vmem:[#allocation3 + $0xe4] sm:$0xf]  ;;  %v424_v21 = vor.u32 %v511_v18, %v421_v19  ;;  %v485_v22 = vld [vmem:[#allocation3 + $0xe8] sm:$0xf0]  ;;  %v411_v23 = vld [vmem:[#allocation3 + $0x50] sm:$0xf] }
   0xc   :  { %289 = vmatpush.bf16.msra.mxu3 %v496_v12  ;;  %v510_v24 = vld [vmem:[#allocation3 + $0x54] sm:$0xf0]  ;;  %v488_v25 = vor.u32 %v527_v20, %v485_v22  ;;  %v475_v26 = vld [vmem:[#allocation3 + $0xd0] sm:$0xf]  ;;  %v509_v28 = vld [vmem:[#allocation3 + $0x54] sm:$0xf] }
   0xd   :  { %v526_v27 = vld [vmem:[#allocation3 + $0xd4] sm:$0xf0]  ;;  %248 = vmatpush.bf16.msra.mxu0 %v420_v16  ;;  %v412_v29 = vor.u32 %v510_v24, %v411_v23  ;;  %v413_v30 = vld [vmem:[#allocation3 + $0x58] sm:$0xf0]  ;;  %v525_v31 = vld [vmem:[#allocation3 + $0xd4] sm:$0xf] }
   0xe   :  { %v477_v32 = vld [vmem:[#allocation3 + $0xd8] sm:$0xf0]  ;;  %262 = vmatpush.bf16.msra.mxu1 %v484_v17  ;;  %v476_v33 = vor.u32 %v526_v27, %v475_v26  ;;  %v416_v34 = vor.u32 %v509_v28, %v413_v30  ;;  %v403_v35 = vld [vmem:[#allocation3 + $0x40] sm:$0xf]  ;;  %v508_v36 = vld [vmem:[#allocation3 + $0x44] sm:$0xf0] }
   0xf   :  { %276 = vmatpush.bf16.msra.mxu2 %v424_v21  ;;  %v467_v37 = vld [vmem:[#allocation3 + $0xc0] sm:$0xf]  ;;  %v480_v38 = vor.u32 %v525_v31, %v477_v32  ;;  %v524_v39 = vld [vmem:[#allocation3 + $0xc4] sm:$0xf0]  ;;  %v507_v40 = vld [vmem:[#allocation3 + $0x44] sm:$0xf]  ;;  %v404_v44 = vor.u32 %v508_v36, %v403_v35 }
  0x10   :  { %290 = vmatpush.bf16.msra.mxu3 %v488_v25  ;;  %v405_v41 = vld [vmem:[#allocation3 + $0x48] sm:$0xf0]  ;;  %v523_v42 = vld [vmem:[#allocation3 + $0xc4] sm:$0xf]  ;;  %v468_v45 = vor.u32 %v524_v39, %v467_v37  ;;  %v395_v47 = vld [vmem:[#allocation3 + $0x30] sm:$0xf] }
  0x11   :  { %v469_v43 = vld [vmem:[#allocation3 + $0xc8] sm:$0xf0]  ;;  %249 = vmatpush.bf16.msra.mxu0 %v412_v29  ;;  %v408_v46 = vor.u32 %v507_v40, %v405_v41  ;;  %v506_v48 = vld [vmem:[#allocation3 + $0x34] sm:$0xf0]  ;;  %v459_v49 = vld [vmem:[#allocation3 + $0xb0] sm:$0xf] }
  0x12   :  { %263 = vmatpush.bf16.msra.mxu1 %v476_v33  ;;  %v472_v50 = vor.u32 %v523_v42, %v469_v43  ;;  %v522_v51 = vld [vmem:[#allocation3 + $0xb4] sm:$0xf0]  ;;  %v505_v52 = vld [vmem:[#allocation3 + $0x34] sm:$0xf]  ;;  %v397_v53 = vld [vmem:[#allocation3 + $0x38] sm:$0xf0]  ;;  %v396_v56 = vor.u32 %v506_v48, %v395_v47 }
  0x13   :  { %277 = vmatpush.bf16.msra.mxu2 %v416_v34  ;;  %v521_v54 = vld [vmem:[#allocation3 + $0xb4] sm:$0xf]  ;;  %v461_v55 = vld [vmem:[#allocation3 + $0xb8] sm:$0xf0]  ;;  %v460_v57 = vor.u32 %v522_v51, %v459_v49  ;;  %v400_v58 = vor.u32 %v505_v52, %v397_v53  ;;  %v387_v59 = vld [vmem:[#allocation3 + $0x20] sm:$0xf] }
  0x14   :  { %291 = vmatpush.bf16.msra.mxu3 %v480_v38  ;;  %v504_v60 = vld [vmem:[#allocation3 + $0x24] sm:$0xf0]  ;;  %v451_v61 = vld [vmem:[#allocation3 + $0xa0] sm:$0xf]  ;;  %v464_v62 = vor.u32 %v521_v54, %v461_v55  ;;  %v503_v0 = vld [vmem:[#allocation3 + $0x24] sm:$0xf] }
  0x15   :  { %250 = vmatpush.bf16.msra.mxu0 %v404_v44  ;;  %v520_v63 = vld [vmem:[#allocation3 + $0xa4] sm:$0xf0]  ;;  %v389_v1 = vld [vmem:[#allocation3 + $0x28] sm:$0xf0]  ;;  %v519_v2 = vld [vmem:[#allocation3 + $0xa4] sm:$0xf]  ;;  %v388_v4 = vor.u32 %v504_v60, %v387_v59 }
  0x16   :  { %264 = vmatpush.bf16.msra.mxu1 %v468_v45  ;;  %v453_v3 = vld [vmem:[#allocation3 + $0xa8] sm:$0xf0]  ;;  %v452_v5 = vor.u32 %v520_v63, %v451_v61  ;;  %v392_v6 = vor.u32 %v503_v0, %v389_v1  ;;  %v379_v7 = vld [vmem:[#allocation3 + $0x10] sm:$0xf]  ;;  %v502_v8 = vld [vmem:[#allocation3 + $0x14] sm:$0xf0] }
  0x17   :  { %278 = vmatpush.bf16.msra.mxu2 %v408_v46  ;;  %v443_v9 = vld [vmem:[#allocation3 + $0x90] sm:$0xf]  ;;  %v456_v10 = vor.u32 %v519_v2, %v453_v3  ;;  %v518_v11 = vld [vmem:[#allocation3 + $0x94] sm:$0xf0]  ;;  %v501_v12 = vld [vmem:[#allocation3 + $0x14] sm:$0xf]  ;;  %v380_v17 = vor.u32 %v502_v8, %v379_v7 }
  0x18   :  { %292 = vmatpush.bf16.msra.mxu3 %v472_v50  ;;  %v381_v13 = vld [vmem:[#allocation3 + $0x18] sm:$0xf0]  ;;  %v517_v14 = vld [vmem:[#allocation3 + $0x94] sm:$0xf]  ;;  %v314_v16 = vld [vmem:[%s648_s2] sm:$0xff]  ;;  %v598_v19 = vmov 0   ;;  %v444_v21 = vor.u32 %v518_v11, %v443_v9 }
  0x19   :  { %251 = vmatpush.bf16.msra.mxu0 %v396_v56  ;;  %v445_v15 = vld [vmem:[#allocation3 + $0x98] sm:$0xf0]  ;;  %v371_v18 = vld [vmem:[#allocation3] sm:$0xf]  ;;  %538 = vset.pattern.permute.xlu0 %v598_v19  ;;  %v316_v20 = vmax.f32 %v314_v16, 1.0  ;;  %v384_v22 = vor.u32 %v501_v12, %v381_v13  ;;  %v315_v29 = vld [vmem:[%s648_s2 + $0x8] sm:$0xff] }
  0x1a   :  { %265 = vmatpush.bf16.msra.mxu1 %v460_v57  ;;  %v500_v23 = vld [vmem:[#allocation3 + $0x4] sm:$0xf0]  ;;  %v435_v24 = vld [vmem:[#allocation3 + $0x80] sm:$0xf]  ;;  %v448_v26 = vor.u32 %v517_v14, %v445_v15  ;;  %v499_v27 = vld [vmem:[#allocation3 + $0x4] sm:$0xf] }
  0x1b   :  { %279 = vmatpush.bf16.msra.mxu2 %v400_v58  ;;  %v516_v25 = vld [vmem:[#allocation3 + $0x84] sm:$0xf0]  ;;  %v373_v28 = vld [vmem:[#allocation3 + $0x8] sm:$0xf0]  ;;  %539 = vrcp.f32 %v316_v20  ;;  %v515_v30 = vld [vmem:[#allocation3 + $0x84] sm:$0xf]  ;;  %v372_v32 = vor.u32 %v500_v23, %v371_v18 }
  0x1c   :  { %293 = vmatpush.bf16.msra.mxu3 %v464_v62  ;;  %v437_v31 = vld [vmem:[#allocation3 + $0x88] sm:$0xf0]  ;;  %v363_v33 = vld [vmem:[%s646_s0] sm:$0xf]  ;;  %v498_v34 = vld [vmem:[%s646_s0 + $0x4] sm:$0xf0]  ;;  %v436_v35 = vor.u32 %v516_v25, %v435_v24  ;;  %v376_v36 = vor.u32 %v499_v27, %v373_v28 }
  0x1d   :  { %252 = vmatpush.bf16.msra.mxu0 %v388_v4  ;;  %v497_v37 = vld [vmem:[%s646_s0 + $0x4] sm:$0xf]  ;;  %v365_v38 = vld [vmem:[%s646_s0 + $0x8] sm:$0xf0]  ;;  %v317_v39 = vmax.f32 %v315_v29, 1.0  ;;  %v440_v40 = vor.u32 %v515_v30, %v437_v31  ;;  %v364_v41 = vor.u32 %v498_v34, %v363_v33  ;;  %s599_s0 = smov [#allocation6]  }
  0x1e   :  { %266 = vmatpush.bf16.msra.mxu1 %v452_v5  ;;  %v368_v43 = vor.u32 %v497_v37, %v365_v38  ;;  %s346_s29 = sshll.u32 %s599_s0, 4  ;;  %s348_s5 = sshll.u32 %s649_s3, 4  ;;  %s347_s29 = int_to_ptr.vmem [resolvable:$true] %s346_s29  ;;  %s349_s5 = int_to_ptr.hbm [resolvable:$true] %s348_s5 }
  0x1f   :  { %280 = vmatpush.bf16.msra.mxu2 %v392_v6  ;;  %541 = vrcp.f32 %v317_v39  ;;  %s600_s6 = smov 256   ;;  %s601_s7 = smov 16  }
  0x20   :  { %294 = vmatpush.bf16.msra.mxu3 %v456_v10 }
  0x21   :  { %253 = vmatpush.bf16.msra.mxu0 %v380_v17  ;;  %v540_v42 = vpop.eup %539 }
  0x22   :  { %267 = vmatpush.bf16.msra.mxu1 %v444_v21  ;;  %326 = vperm.xlu0 %538, %v540_v42  }
  0x23   :  { %281 = vmatpush.bf16.msra.mxu2 %v384_v22 }
  0x24   :  { %295 = vmatpush.bf16.msra.mxu3 %v448_v26 }
  0x25   :  { %254 = vmatpush.bf16.msra.mxu0 %v372_v32  ;;  %v542_v44 = vpop.eup %541 }
  0x26   :  { %268 = vmatpush.bf16.msra.mxu1 %v436_v35 }
  0x27   :  { %282 = vmatpush.bf16.msra.mxu2 %v376_v36 }
  0x28   :  { %296 = vmatpush.bf16.msra.mxu3 %v440_v40  ;;  %255 = vmatmul.bf16.vlgmr.msra.gmra.mxu0 %v364_v41 }
  0x29   :  { %269 = vmatmul.bf16.vlgmr.msra.gmra.mxu1 %v368_v43 }
  0x2a   :  { %283 = vmatmul.bf16.vlgmr.msra.gmra.mxu2 %v364_v41  ;;  %331 = vperm.xlu0 %538, %v542_v44  }
  0x2b   :  { %297 = vmatmul.bf16.vlgmr.msra.gmra.mxu3 %v368_v43 }
  0x94   :  { %v327_v46 = vpop.permute.xlu0 %326 }
  0x9c   :  { %v332_v57 = vpop.permute.xlu0 %331 }
  0xa5   :  { %v256_v45 = vpop.f32.mrf.mxu0 }
  0xa6   :  { %v270_v47 = vpop.f32.mrf.mxu1 }
  0xa7   :  { %v271_v48 = vadd.f32 %v270_v47, %v256_v45 }
  0xa9   :  { %v334_v49 = vmul.f32 %v327_v46, %v271_v48 }
  0xab   :  { %338 = vst [vmem:[#allocation6] sm:$0xff] %v334_v49 }
  0xad   :  { %v284_v50 = vpop.f32.mrf.mxu2  ;;  %v258_v52 = vpop.f32.mrf.mxu0 }
  0xae   :  { %v298_v51 = vpop.f32.mrf.mxu3  ;;  %v272_v54 = vpop.f32.mrf.mxu1 }
  0xaf   :  { %v299_v53 = vadd.f32 %v298_v51, %v284_v50  ;;  %v273_v55 = vadd.f32 %v272_v54, %v258_v52 }
  0xb1   :  { %v335_v56 = vmul.f32 %v327_v46, %v299_v53  ;;  %v336_v58 = vmul.f32 %v332_v57, %v273_v55 }
  0xb3   :  { %339 = vst [vmem:[#allocation6 + $0x8] sm:$0xff] %v335_v56 }
  0xb4   :  { %340 = vst [vmem:[#allocation6 + $0x10] sm:$0xff] %v336_v58 }
  0xb5   :  { %v286_v59 = vpop.f32.mrf.mxu2 }
  0xb6   :  { %v300_v60 = vpop.f32.mrf.mxu3 }
  0xb7   :  { %v301_v61 = vadd.f32 %v300_v60, %v286_v59 }
  0xb9   :  { %v337_v62 = vmul.f32 %v332_v57, %v301_v61 }
  0xbb   :  { %341 = vst [vmem:[#allocation6 + $0x18] sm:$0xff] %v337_v62 }
  0xbc   :  { %354 = dma.vmem_to_hbm [thread:$0]  %s347_s29, 512, %s349_s5, [#allocation5], %s600_s6, %s600_s6, %s601_s7  }
  0xbd   :  { %593 = dma.done.wait [#allocation5], 512  }
  0xbe   :  { %594 = vsyncadd [#allocation5], 4294966784 }
  0xbf   :  { %359 = vsyncpa [#allocation4], 1 }
  0xc0   :  { %360 = vsyncpa [#allocation5], 1 }

</bundles_post_ra>
